<compile_context>
chip_gen: v6e
topology: v6e:2x2x1
jax: 0.10.0
libtpu: 0.0.40
codegen_flags: <defaults>
</compile_context>

<pallas_src>
import functools

import jax
import jax.numpy as jnp
import numpy as np
from jax.experimental import pallas as pl
from jax.experimental.pallas import tpu as pltpu

# Fixed graph from the module (edge_index[0]=source, edge_index[1]=target).
EDGE_INDEX = np.array([[0, 1, 2, 1, 2, 3],
                       [1, 2, 1, 0, 3, 2]], dtype=np.int32)
NUM_NODES = 4

MAX_GRAPHS_PER_BLOCK = 1024   # upper bound on Bt (graphs per grid step)


def _round_up(v, m):
    return -(-v // m) * m


def build_norm_adj_np(edge_index, num_nodes):
    """Host-side dense GCN normalization: D^-1/2 (A + I) D^-1/2 (PyG gcn_norm)."""
    src, dst = np.asarray(edge_index)
    a = np.zeros((num_nodes, num_nodes), np.float64)
    a[dst, src] = 1.0                                     # message flows source -> target
    a[np.arange(num_nodes), np.arange(num_nodes)] = 1.0   # self-loops
    deg = a.sum(axis=1)
    d_inv_sqrt = 1.0 / np.sqrt(deg)
    return (a * d_inv_sqrt[:, None] * d_inv_sqrt[None, :]).astype(np.float32)


def _gcn2_kernel(x_ref, w1_ref, b1_ref, w2_ref, b2_ref, o_ref):
    # Layer 1: A_hat folded into W1f -> single MXU matmul, f32 accumulation.
    h = jnp.dot(x_ref[...], w1_ref[...],
                preferred_element_type=jnp.float32)        # [bt, N*H] f32
    h = jnp.maximum(h + b1_ref[...], 0.0)                  # bias + ReLU in f32
    # Layer 2: A_hat folded into W2f -> single MXU matmul, f32 accumulation.
    g = jnp.dot(h.astype(jnp.bfloat16), w2_ref[...],
                preferred_element_type=jnp.float32)        # [bt, N*Cout] f32
    o_ref[...] = g + b2_ref[...]


@functools.partial(jax.jit, static_argnums=(0,))
def _jte_impl(a_hat_tup, x, w1, b1, w2, b2):
    a_hat = jnp.asarray(np.asarray(a_hat_tup, dtype=np.float32))
    n = len(a_hat_tup)

    batch, n_x, cin = x.shape
    assert n_x == n
    hidden = w1.shape[1]
    cout = w2.shape[1]
    kin, kmid, kout = n * cin, n * hidden, n * cout

    # ---- Kronecker-fold A_hat into the weights (tiny, done once per call) ----
    # out[b, i, h] = sum_{j,c} x[b, j, c] * A_hat[i, j] * W[c, h]  + b[h]
    w1f = jnp.einsum('ij,ch->jcih', a_hat, w1).reshape(kin, kmid).astype(jnp.bfloat16)
    w2f = jnp.einsum('ij,co->jcio', a_hat, w2).reshape(kmid, kout).astype(jnp.bfloat16)
    b1f = jnp.tile(b1.astype(jnp.float32), n).reshape(1, kmid)
    b2f = jnp.tile(b2.astype(jnp.float32), n).reshape(1, kout)

    # ---- per-graph flattened rows: free view, no transpose ----
    xf = x.reshape(batch, kin).astype(jnp.bfloat16)        # [B, N*Cin] bf16

    # Tile choice: largest block up to MAX_GRAPHS_PER_BLOCK that keeps >= 2 grid
    # steps (so the 'parallel' batch axis can use both TCs on v7x); multiple of 8
    # for sublane alignment.
    bt = min(MAX_GRAPHS_PER_BLOCK, _round_up(max(8, -(-batch // 2)), 8))
    b_pad = _round_up(batch, bt)
    g_steps = b_pad // bt
    if b_pad != batch:
        # Small tail pad (< bt rows of kin bf16 each).
        # TODO(synk): a masked ragged tail (SMEM row count + pl.when) would avoid
        # re-copying xf for very large batches with awkward sizes.
        xf = jnp.pad(xf, ((0, b_pad - batch), (0, 0)))

    out = pl.pallas_call(
        _gcn2_kernel,
        out_shape=jax.ShapeDtypeStruct((b_pad, kout), jnp.float32),
        grid=(g_steps,),
        in_specs=[
            pl.BlockSpec((bt, kin), lambda gi: (gi, 0)),       # activations
            pl.BlockSpec((kin, kmid), lambda gi: (0, 0)),      # W1f (VMEM-resident)
            pl.BlockSpec((1, kmid), lambda gi: (0, 0)),        # b1 tiled per node
            pl.BlockSpec((kmid, kout), lambda gi: (0, 0)),     # W2f (VMEM-resident)
            pl.BlockSpec((1, kout), lambda gi: (0, 0)),        # b2 tiled per node
        ],
        out_specs=pl.BlockSpec((bt, kout), lambda gi: (gi, 0)),
        compiler_params=pltpu.CompilerParams(
            dimension_semantics=("parallel",)),                # megacore sharding on v7x
    )(xf, w1f, b1f, w2f, b2f)

    # Epilogue: leading-axis slice + free view reshape (no transpose, no lane padding).
    return out[:batch].reshape(batch, n, cout)


def journey_time_estimator(x, edge_index, w1, b1, w2, b2):
    """x: [B, N, Cin] (or [N, Cin]) float32; wk: [C_in, C_out]; bk: [C_out]."""
    single = x.ndim == 2
    if single:
        x = x[None]
    n = x.shape[1]
    a_hat = build_norm_adj_np(edge_index, n)   # host-time constant (graph is fixed)
    a_hat_tup = tuple(tuple(float(v) for v in row) for row in a_hat)
    out = _jte_impl(a_hat_tup, x, w1, b1, w2, b2)
    return out[0] if single else out


def reference(x, edge_index, w1, b1, w2, b2):
    a_hat = jnp.asarray(build_norm_adj_np(edge_index, x.shape[-2]))
    h = jnp.maximum(jnp.einsum('ij,...jc->...ic', a_hat, x @ w1) + b1, 0.0)
    return jnp.einsum('ij,...jc->...ic', a_hat, h @ w2) + b2


if __name__ == "__main__":
    in_channels, hidden_channels, out_channels = 16, 32, 8
    batch = 256   # -> bt = 128 graphs/step, 2 grid steps, no batch padding

    key = jax.random.PRNGKey(0)
    k_x, k_w1, k_b1, k_w2, k_b2 = jax.random.split(key, 5)

    x = jax.random.normal(k_x, (batch, NUM_NODES, in_channels), dtype=jnp.float32)
    w1 = jax.random.normal(k_w1, (in_channels, hidden_channels), dtype=jnp.float32) * 0.1
    b1 = jax.random.normal(k_b1, (hidden_channels,), dtype=jnp.float32) * 0.1
    w2 = jax.random.normal(k_w2, (hidden_channels, out_channels), dtype=jnp.float32) * 0.1
    b2 = jax.random.normal(k_b2, (out_channels,), dtype=jnp.float32) * 0.1

    out = jax.block_until_ready(journey_time_estimator(x, EDGE_INDEX, w1, b1, w2, b2))
    ref = jax.block_until_ready(reference(x, EDGE_INDEX, w1, b1, w2, b2))

    assert out.shape == (batch, NUM_NODES, out_channels)
    # bf16 MXU inputs (including the bf16-cast folded A_hat (x) W weights) with f32
    # accumulation -> ~1e-2 abs agreement vs the f32 reference.
    max_err = float(jnp.max(jnp.abs(out - ref)))
    assert jnp.allclose(out, ref, atol=5e-2, rtol=5e-2), max_err

    # Single-graph path (matches the original module's [N, Cin] forward signature).
    out1 = jax.block_until_ready(journey_time_estimator(x[0], EDGE_INDEX, w1, b1, w2, b2))
    assert out1.shape == (NUM_NODES, out_channels)
    assert jnp.allclose(out1, ref[0], atol=5e-2, rtol=5e-2)

    print("KERNEL_OK")
</pallas_src>

<mosaic_0001>
module attributes {stable_mosaic.version = 11 : i64} {
  func.func @_gcn2_kernel(%arg0: i32, %arg1: memref<128x64xbf16, #tpu.memory_space<vmem>>, %arg2: memref<64x128xbf16, #tpu.memory_space<vmem>>, %arg3: memref<1x128xf32, #tpu.memory_space<vmem>>, %arg4: memref<128x32xbf16, #tpu.memory_space<vmem>>, %arg5: memref<1x32xf32, #tpu.memory_space<vmem>>, %arg6: memref<128x32xf32, #tpu.memory_space<vmem>>) attributes {dimension_semantics = [#tpu.dimension_semantics<parallel>], iteration_bounds = array<i64: 2>, scalar_prefetch = 0 : i64, scratch_operands = 0 : i64, tpu.core_type = #tpu.core_type<tc>, window_params = [{transform_indices = @transform_0, window_bounds = array<i64: 128, 64>}, {pipeline_mode = #tpu.pipeline_mode<synchronous>, transform_indices = @transform_1, window_bounds = array<i64: 64, 128>}, {pipeline_mode = #tpu.pipeline_mode<synchronous>, transform_indices = @transform_2, window_bounds = array<i64: 1, 128>}, {pipeline_mode = #tpu.pipeline_mode<synchronous>, transform_indices = @transform_3, window_bounds = array<i64: 128, 32>}, {pipeline_mode = #tpu.pipeline_mode<synchronous>, transform_indices = @transform_4, window_bounds = array<i64: 1, 32>}, {transform_indices = @transform_5, window_bounds = array<i64: 128, 32>}]} {
    %c0 = arith.constant 0 : index
    %c0_0 = arith.constant 0 : index
    %0 = vector.load %arg1[%c0, %c0_0] : memref<128x64xbf16, #tpu.memory_space<vmem>>, vector<128x64xbf16>
    %c0_1 = arith.constant 0 : index
    %c0_2 = arith.constant 0 : index
    %1 = vector.load %arg2[%c0_1, %c0_2] : memref<64x128xbf16, #tpu.memory_space<vmem>>, vector<64x128xbf16>
    %cst = arith.constant dense<0.000000e+00> : vector<128x128xf32>
    %2 = tpu.matmul %0, %1, %cst {dimension_numbers = #tpu.dot_dimension_numbers<[1], [0], [0], [1], [0, 0, 1, 1], [], []>} : vector<128x64xbf16>, vector<64x128xbf16>, vector<128x128xf32> -> vector<128x128xf32>
    %c0_3 = arith.constant 0 : index
    %c0_4 = arith.constant 0 : index
    %3 = vector.load %arg3[%c0_3, %c0_4] : memref<1x128xf32, #tpu.memory_space<vmem>>, vector<1x128xf32>
    %4 = vector.broadcast %3 : vector<1x128xf32> to vector<128x128xf32>
    %5 = arith.addf %2, %4 : vector<128x128xf32>
    %cst_5 = arith.constant 0.000000e+00 : f32
    %6 = vector.broadcast %cst_5 : f32 to vector<128x128xf32>
    %7 = arith.maximumf %5, %6 : vector<128x128xf32>
    %8 = arith.truncf %7 : vector<128x128xf32> to vector<128x128xbf16>
    %c0_6 = arith.constant 0 : index
    %c0_7 = arith.constant 0 : index
    %9 = vector.load %arg4[%c0_6, %c0_7] : memref<128x32xbf16, #tpu.memory_space<vmem>>, vector<128x32xbf16>
    %cst_8 = arith.constant dense<0.000000e+00> : vector<128x32xf32>
    %10 = tpu.matmul %8, %9, %cst_8 {dimension_numbers = #tpu.dot_dimension_numbers<[1], [0], [0], [1], [0, 0, 1, 1], [], []>} : vector<128x128xbf16>, vector<128x32xbf16>, vector<128x32xf32> -> vector<128x32xf32>
    %c0_9 = arith.constant 0 : index
    %c0_10 = arith.constant 0 : index
    %11 = vector.load %arg5[%c0_9, %c0_10] : memref<1x32xf32, #tpu.memory_space<vmem>>, vector<1x32xf32>
    %12 = vector.broadcast %11 : vector<1x32xf32> to vector<128x32xf32>
    %13 = arith.addf %10, %12 : vector<128x32xf32>
    %c0_11 = arith.constant 0 : index
    %c0_12 = arith.constant 0 : index
    %14 = vector.load %arg6[%c0_11, %c0_12] : memref<128x32xf32, #tpu.memory_space<vmem>>, vector<128x32xf32>
    tpu.vector_store %arg6[%c0_11, %c0_12], %13 {strides = array<i32>} : memref<128x32xf32, #tpu.memory_space<vmem>>, vector<128x32xf32>,
    return
  }
  func.func @transform_0(%arg0: i32) -> (i32, i32) {
    %c0_i32 = arith.constant 0 : i32
    %c0_i32_0 = arith.constant 0 : i32
    return %arg0, %c0_i32 : i32, i32
  }
  func.func @transform_1(%arg0: i32) -> (i32, i32) {
    %c0_i32 = arith.constant 0 : i32
    %c0_i32_0 = arith.constant 0 : i32
    %c0_i32_1 = arith.constant 0 : i32
    return %c0_i32, %c0_i32_0 : i32, i32
  }
  func.func @transform_2(%arg0: i32) -> (i32, i32) {
    %c0_i32 = arith.constant 0 : i32
    %c0_i32_0 = arith.constant 0 : i32
    %c0_i32_1 = arith.constant 0 : i32
    return %c0_i32, %c0_i32_0 : i32, i32
  }
  func.func @transform_3(%arg0: i32) -> (i32, i32) {
    %c0_i32 = arith.constant 0 : i32
    %c0_i32_0 = arith.constant 0 : i32
    %c0_i32_1 = arith.constant 0 : i32
    return %c0_i32, %c0_i32_0 : i32, i32
  }
  func.func @transform_4(%arg0: i32) -> (i32, i32) {
    %c0_i32 = arith.constant 0 : i32
    %c0_i32_0 = arith.constant 0 : i32
    %c0_i32_1 = arith.constant 0 : i32
    return %c0_i32, %c0_i32_0 : i32, i32
  }
  func.func @transform_5(%arg0: i32) -> (i32, i32) {
    %c0_i32 = arith.constant 0 : i32
    %c0_i32_0 = arith.constant 0 : i32
    return %arg0, %c0_i32 : i32, i32
  }
}

</mosaic_0001>

<bundles_post_ra>
// kernel: tile.19
= control target key start
LH: loop header
LB: loop body
LE: loop exit
PB: predicated region body
PF: predicated region fallthrough
CT: control target
= control target key end

     0   :  { %vm8_vm0 = vcmask 64512   ;;  %s40_s8 = smov 8   ;;  %s41_s9 = smov 16   ;;  %vm14_vm1 = vcmask 261312   ;;  %vm20_vm2 = vcmask 195712   ;;  %vm26_vm3 = vcmask 130112   ;;  %s58_s0 = inlined_call_operand.vmem [shape: f32[4,8], index: 0, kind: input, shape index: {}]   ;;  %s59_s1 = inlined_call_operand.vmem [shape: f32[1,32], index: 1, kind: output, shape index: {}]  }
   0x1   :  { %v5_v0 = vld [vmem:[%s58_s0] sm:$0xf]  ;;  %s39_s0 = smov 24  }
   0x2   :  { %6 = vst [vmem:[#allocation1] sm:$0xf] %v5_v0 }
   0x9   :  { %v11_v1 = vld [vmem:[#allocation1 + $0x3] sm:$0x1]   ;;  %v23_v2 = vld [vmem:[#allocation1 + $0x1] sm:$0x1]   ;;  %v7_v3 = vld [vmem:[#allocation1] sm:$0x1]  }
   0xa   :  { %12 = vrot.lane.b32.xlu0 %v11_v1, %s39_s0  ;;  %24 = vrot.lane.b32.xlu1 %v23_v2, %s40_s8  ;;  %v17_v4 = vld [vmem:[#allocation1 + $0x2] sm:$0x1]   ;;  %9 = vst.msk [vmem:[#allocation0] sm:$0x1] %vm8_vm0, %v7_v3  }
   0xe   :  { %18 = vrot.lane.b32.xlu0 %v17_v4, %s41_s9 }
  0x7c   :  { %v13_v5 = vpop.permute.xlu0 %12   ;;  %v25_v6 = vpop.permute.xlu1 %24  }
  0x7d   :  { %15 = vst.msk [vmem:[#allocation0] sm:$0x1] %vm14_vm1, %v13_v5  }
  0x80   :  { %v19_v7 = vpop.permute.xlu0 %18  }
  0x81   :  { %21 = vst.msk [vmem:[#allocation0] sm:$0x1] %vm20_vm2, %v19_v7  }
  0x82   :  { %27 = vst.msk [vmem:[#allocation0] sm:$0x1] %vm26_vm3, %v25_v6  }
  0x89   :  { %v32_v8 = vld [vmem:[#allocation0] sm:$0x1] }
  0x8a   :  { %35 = vst [vmem:[%s59_s1] sm:$0x1] %v32_v8 }

// kernel: tile.14
= control target key start
LH: loop header
LB: loop body
LE: loop exit
PB: predicated region body
PF: predicated region fallthrough
CT: control target
= control target key end

     0   :  { %vm8_vm0 = vcmask 261120   ;;  %s40_s8 = smov 32   ;;  %s41_s9 = smov 64   ;;  %vm14_vm1 = vcmask 1048320   ;;  %vm20_vm2 = vcmask 785920   ;;  %vm26_vm3 = vcmask 523520   ;;  %s58_s0 = inlined_call_operand.vmem [shape: f32[4,32], index: 0, kind: input, shape index: {}]   ;;  %s59_s1 = inlined_call_operand.vmem [shape: f32[1,128], index: 1, kind: output, shape index: {}]  }
   0x1   :  { %v5_v0 = vld [vmem:[%s58_s0] sm:$0xf]  ;;  %s39_s0 = smov 96  }
   0x2   :  { %6 = vst [vmem:[#allocation1] sm:$0xf] %v5_v0 }
   0x9   :  { %v11_v1 = vld [vmem:[#allocation1 + $0x3] sm:$0x1]   ;;  %v23_v2 = vld [vmem:[#allocation1 + $0x1] sm:$0x1]   ;;  %v7_v3 = vld [vmem:[#allocation1] sm:$0x1]  }
   0xa   :  { %12 = vrot.lane.b32.xlu0 %v11_v1, %s39_s0  ;;  %24 = vrot.lane.b32.xlu1 %v23_v2, %s40_s8  ;;  %v17_v4 = vld [vmem:[#allocation1 + $0x2] sm:$0x1]   ;;  %9 = vst.msk [vmem:[#allocation0] sm:$0x1] %vm8_vm0, %v7_v3  }
   0xe   :  { %18 = vrot.lane.b32.xlu0 %v17_v4, %s41_s9 }
  0x7c   :  { %v13_v5 = vpop.permute.xlu0 %12   ;;  %v25_v6 = vpop.permute.xlu1 %24  }
  0x7d   :  { %15 = vst.msk [vmem:[#allocation0] sm:$0x1] %vm14_vm1, %v13_v5  }
  0x80   :  { %v19_v7 = vpop.permute.xlu0 %18  }
  0x81   :  { %21 = vst.msk [vmem:[#allocation0] sm:$0x1] %vm20_vm2, %v19_v7  }
  0x82   :  { %27 = vst.msk [vmem:[#allocation0] sm:$0x1] %vm26_vm3, %v25_v6  }
  0x89   :  { %v32_v8 = vld [vmem:[#allocation0] sm:$0x1] }
  0x8a   :  { %35 = vst [vmem:[%s59_s1] sm:$0x1] %v32_v8 }

// kernel: tile.18
= control target key start
LH: loop header
LB: loop body
LE: loop exit
PB: predicated region body
PF: predicated region fallthrough
CT: control target
= control target key end

     0   :  { %s22_s0 = inlined_call_operand.vmem [shape: f32[8], index: 0, kind: input, shape index: {}]   ;;  %s23_s1 = inlined_call_operand.vmem [shape: f32[4,8], index: 1, kind: output, shape index: {}]  }
   0x1   :  { %v4_v0 = vld [vmem:[%s22_s0] ss:$0 sm:$0xff] }
   0x2   :  { %5 = vst [vmem:[%s23_s1] sm:$0xf] %v4_v0 }

// kernel: tile.13
= control target key start
LH: loop header
LB: loop body
LE: loop exit
PB: predicated region body
PF: predicated region fallthrough
CT: control target
= control target key end

     0   :  { %s22_s0 = inlined_call_operand.vmem [shape: f32[32], index: 0, kind: input, shape index: {}]   ;;  %s23_s1 = inlined_call_operand.vmem [shape: f32[4,32], index: 1, kind: output, shape index: {}]  }
   0x1   :  { %v4_v0 = vld [vmem:[%s22_s0] ss:$0 sm:$0xff] }
   0x2   :  { %5 = vst [vmem:[%s23_s1] sm:$0xf] %v4_v0 }

// kernel: _jte_impl.1
= control target key start
LH: loop header
LB: loop body
LE: loop exit
PB: predicated region body
PF: predicated region fallthrough
CT: control target
= control target key end

     0   :  { %s918_s18 = smov 0   ;;  %s1033_s0 = inlined_call_operand.vmem [shape: bf16[256,64], index: 0, kind: input, shape index: {}]   ;;  %s1034_s1 = inlined_call_operand.vmem [shape: bf16[64,128], index: 1, kind: input, shape index: {}]   ;;  %s1035_s2 = inlined_call_operand.vmem [shape: f32[1,128], index: 2, kind: input, shape index: {}]   ;;  %s1036_s3 = inlined_call_operand.vmem [shape: bf16[128,32], index: 3, kind: input, shape index: {}]   ;;  %s1037_s4 = inlined_call_operand.vmem [shape: f32[1,32], index: 4, kind: input, shape index: {}]   ;;  %s1038_s5 = inlined_call_operand.vmem [shape: f32[256,32], index: 5, kind: output, shape index: {}]  }
   0x1 LB: > { %s711_s19 = sadd.s32 4294967295, %s886_s18   ;;  %p715_p0 = scmp.ge.s32.totalorder %s886_s18, 1  ;;  %s886_s18 = sphi %s918_s18, %s15_s18  }
   0x2   : > { %p188_p1 = scmp.lt.s32.totalorder %s886_s18, 3 }
   0x4   : > { %p189_p2 = pnand %p715_p0, %p188_p1 }
   0x5   : > { %s716_s22 = sshll.u32 (!%p189_p2), %s711_s19, 4 }
   0x6   : > { %192 = sbr.rel (%p189_p2) target bundleno = 460 (0x1cc), region = 40  ;;  %p217_p3 = scmp.lt.s32.totalorder (!%p189_p2), %s716_s22, 31 }
   0xb   : > { %v860_v0 = vld [vmem:[%s1034_s1 + $0x18] sm:$0xff]   ;;  %v861_v1 = vld [vmem:[%s1034_s1 + $0x10] sm:$0xff]   ;;  %v862_v2 = vld [vmem:[%s1034_s1 + $0x8] sm:$0xff]   ;;  %s1040_s22 = smov (!%p217_p3, %s716_s22), 31  ;;  %vm324_vm0 = vcmask 523264   ;;  %vm638_vm1 = vcmask 261120  }
   0xc   : > { %780 = vmatprep.subr.bf16.mxu0 %v860_v0  ;;  %v872_v3 = vld [vmem:[%s1036_s3 + $0x38] sm:$0xff]   ;;  %s717_s29 = sshll.u32 %s1040_s22, 2  ;;  %v873_v4 = vld [vmem:[%s1036_s3 + $0x30] sm:$0xff]   ;;  %v863_v6 = vld [vmem:[%s1034_s1] sm:$0xff]   ;;  %s719_s28 = sshll.u32 %s1040_s22, 3 }
   0xd   : > { %781 = vmatpush3.bf16.msra.mxu0 %v860_v0  ;;  %s944_s7 = scalar_lea.vmem %s1033_s0, %s717_s29  ;;  %836 = vmatprep.subr.bf16.mxu1 %v872_v3  ;;  %v874_v7 = vld [vmem:[%s1036_s3 + $0x28] sm:$0xff]   ;;  %v875_v10 = vld [vmem:[%s1036_s3 + $0x20] sm:$0xff]   ;;  %v876_v11 = vld [vmem:[%s1036_s3 + $0x18] sm:$0xff]   ;;  %s996_s8 = scalar_lea.vmem %s1038_s5, %s719_s28 }
   0xe   : > { %782 = vmatprep.subr.bf16.mxu0 %v861_v1  ;;  %v864_v5 = vld [vmem:[%s944_s7] sm:$0xff]   ;;  %844 = vmatpush3.bf16.msra.mxu1 %v872_v3  ;;  %v865_v8 = vld [vmem:[%s944_s7 + $0x8] sm:$0xff]   ;;  %v866_v9 = vld [vmem:[%s944_s7 + $0x10] sm:$0xff]  }
   0xf   : > { %837 = vmatprep.subr.bf16.mxu1 %v873_v4  ;;  %788 = vmatprep.mubr.msk.bf16.mxu0 %vm324_vm0, %v864_v5  ;;  %v867_v12 = vld [vmem:[%s944_s7 + $0x18] sm:$0xff]   ;;  %v868_v13 = vld [vmem:[%s944_s7 + $0x20] sm:$0xff]   ;;  %v869_v14 = vld [vmem:[%s944_s7 + $0x28] sm:$0xff]  }
  0x10   : > { %v870_v15 = vld [vmem:[%s944_s7 + $0x30] sm:$0xff]   ;;  %v871_v16 = vld [vmem:[%s944_s7 + $0x38] sm:$0xff]   ;;  %v878_v18 = vld [vmem:[%s1036_s3 + $0x8] sm:$0xff]  }
  0x11   : > { %783 = vmatpush3.bf16.msra.mxu0 %v861_v1  ;;  %v877_v17 = vld [vmem:[%s1036_s3 + $0x10] sm:$0xff]   ;;  %v879_v19 = vld [vmem:[%s1036_s3] sm:$0xff]  }
  0x12   : > { %784 = vmatprep.subr.bf16.mxu0 %v862_v2  ;;  %845 = vmatpush3.bf16.msra.mxu1 %v873_v4  ;;  %v720_v22 = vld [vmem:[%s1035_s2] ss:$0 sm:$0xff] }
  0x13   : > { %838 = vmatprep.subr.bf16.mxu1 %v874_v7 }
  0x15   : > { %785 = vmatpush3.bf16.msra.mxu0 %v862_v2 }
  0x16   : > { %786 = vmatprep.subr.bf16.mxu0 %v863_v6  ;;  %846 = vmatpush3.bf16.msra.mxu1 %v874_v7 }
  0x17   : > { %839 = vmatprep.subr.bf16.mxu1 %v875_v10 }
  0x19   : > { %787 = vmatpush3.bf16.msra.mxu0 %v863_v6 }
  0x1a   : > { %804 = vmatprep.subr.bf16.mxu0 %v872_v3  ;;  %847 = vmatpush3.bf16.msra.mxu1 %v875_v10 }
  0x1b   : > { %840 = vmatprep.subr.bf16.mxu1 %v876_v11 }
  0x1c   : > { %789 = vmatmul.mubr.msk.bf16.vlgmr.msra.gmra.mxu0 %vm324_vm0, %v865_v8 }
  0x1d   : > { %792 = vmatprep.mubr.msk.bf16.mxu0 %vm324_vm0, %v866_v9  ;;  %805 = vmatpush3.bf16.msra.mxu0 %v872_v3 }
  0x1e   : > { %806 = vmatprep.subr.bf16.mxu0 %v873_v4  ;;  %848 = vmatpush3.bf16.msra.mxu1 %v876_v11 }
  0x1f   : > { %841 = vmatprep.subr.bf16.mxu1 %v877_v17 }
  0x21   : > { %807 = vmatpush3.bf16.msra.mxu0 %v873_v4 }
  0x22   : > { %808 = vmatprep.subr.bf16.mxu0 %v874_v7  ;;  %849 = vmatpush3.bf16.msra.mxu1 %v877_v17 }
  0x23   : > { %842 = vmatprep.subr.bf16.mxu1 %v878_v18 }
  0x24   : > { %793 = vmatmul.mubr.msk.bf16.gmra.mxu0 %vm324_vm0, %v867_v12 }
  0x25   : > { %796 = vmatprep.mubr.msk.bf16.mxu0 %vm324_vm0, %v868_v13  ;;  %809 = vmatpush3.bf16.msra.mxu0 %v874_v7  ;;  %v741_v13 = vld [vmem:[%s1037_s4] ss:$0 sm:$0xff] }
  0x26   : > { %810 = vmatprep.subr.bf16.mxu0 %v875_v10  ;;  %850 = vmatpush3.bf16.msra.mxu1 %v878_v18 }
  0x27   : > { %843 = vmatprep.subr.bf16.mxu1 %v879_v19 }
  0x29   : > { %811 = vmatpush3.bf16.msra.mxu0 %v875_v10 }
  0x2a   : > { %812 = vmatprep.subr.bf16.mxu0 %v876_v11  ;;  %851 = vmatpush3.bf16.msra.mxu1 %v879_v19 }
  0x2c   : > { %797 = vmatmul.mubr.msk.bf16.gmra.mxu0 %vm324_vm0, %v869_v14 }
  0x2d   : > { %800 = vmatprep.mubr.msk.bf16.mxu0 %vm324_vm0, %v870_v15  ;;  %813 = vmatpush3.bf16.msra.mxu0 %v876_v11 }
  0x2e   : > { %814 = vmatprep.subr.bf16.mxu0 %v877_v17 }
  0x31   : > { %815 = vmatpush3.bf16.msra.mxu0 %v877_v17 }
  0x32   : > { %816 = vmatprep.subr.bf16.mxu0 %v878_v18 }
  0x34   : > { %801 = vmatmul.mubr.msk.bf16.gmra.mxu0 %vm324_vm0, %v871_v16 }
  0x35   : > { %817 = vmatpush3.bf16.msra.mxu0 %v878_v18 }
  0x36   : > { %818 = vmatprep.subr.bf16.mxu0 %v879_v19 }
  0x39   : > { %819 = vmatpush3.bf16.msra.mxu0 %v879_v19 }
  0xdc   : > { %v790_v20 = vpop.f32.mrf.mxu0 }
  0xdd   : > { %v392_v26 = vadd.f32 %v790_v20, %v720_v22 }
  0xde   : > { %v383_v21 = vpop.f32.mrf.mxu0 }
  0xdf   : > { %v384_v24 = vadd.f32 %v720_v22, %v383_v21  ;;  %v448_v33 = vmax.f32 %v392_v26, 0.0 }
  0xe0   : > { %v791_v23 = vpop.f32.mrf.mxu0 }
  0xe1   : > { %v395_v25 = vadd.f32 %v791_v23, %v720_v22  ;;  %v446_v31 = vmax.f32 %v384_v24, 0.0 }
  0xe2   : > { %v386_v27 = vpop.f32.mrf.mxu0 }
  0xe3   : > { %v387_v28 = vadd.f32 %v720_v22, %v386_v27  ;;  %v449_v29 = vmax.f32 %v395_v25, 0.0 }
  0xe4   : > { %v794_v30 = vpop.f32.mrf.mxu0 }
  0xe5   : > { %v447_v32 = vmax.f32 %v387_v28, 0.0  ;;  %v463_v36 = vpack.c.bf16 %v449_v29, %v448_v33  ;;  %v408_v40 = vadd.f32 %v794_v30, %v720_v22 }
  0xe6   : > { %v399_v34 = vpop.f32.mrf.mxu0 }
  0xe7   : > { %v462_v35 = vpack.c.bf16 %v447_v32, %v446_v31  ;;  %v400_v38 = vadd.f32 %v720_v22, %v399_v34  ;;  %v452_v47 = vmax.f32 %v408_v40, 0.0 }
  0xe8   : > { %v795_v37 = vpop.f32.mrf.mxu0 }
  0xe9   : > { %v411_v39 = vadd.f32 %v795_v37, %v720_v22  ;;  %820 = vmatprep.mubr.bf16.mxu0 %v462_v35  ;;  %v450_v45 = vmax.f32 %v400_v38, 0.0 }
  0xea   : > { %v402_v41 = vpop.f32.mrf.mxu0  ;;  %821 = vmatmul.mubr.bf16.vlgmr.msra.gmra.mxu0 %v463_v36 }
  0xeb   : > { %v403_v42 = vadd.f32 %v720_v22, %v402_v41  ;;  %v453_v43 = vmax.f32 %v411_v39, 0.0 }
  0xec   : > { %v798_v44 = vpop.f32.mrf.mxu0 }
  0xed   : > { %v451_v46 = vmax.f32 %v403_v42, 0.0  ;;  %v465_v50 = vpack.c.bf16 %v453_v43, %v452_v47  ;;  %v424_v54 = vadd.f32 %v798_v44, %v720_v22 }
  0xee   : > { %v415_v48 = vpop.f32.mrf.mxu0 }
  0xef   : > { %v464_v49 = vpack.c.bf16 %v451_v46, %v450_v45  ;;  %v416_v52 = vadd.f32 %v720_v22, %v415_v48  ;;  %v456_v61 = vmax.f32 %v424_v54, 0.0 }
  0xf0   : > { %v799_v51 = vpop.f32.mrf.mxu0 }
  0xf1   : > { %v427_v53 = vadd.f32 %v799_v51, %v720_v22  ;;  %824 = vmatprep.mubr.bf16.mxu1 %v464_v49  ;;  %v454_v59 = vmax.f32 %v416_v52, 0.0 }
  0xf2   : > { %v418_v55 = vpop.f32.mrf.mxu0  ;;  %825 = vmatmul.mubr.bf16.vlgmr.msra.gmra.mxu1 %v465_v50 }
  0xf3   : > { %v419_v56 = vadd.f32 %v720_v22, %v418_v55  ;;  %v457_v57 = vmax.f32 %v427_v53, 0.0 }
  0xf4   : > { %v802_v58 = vpop.f32.mrf.mxu0 }
  0xf5   : > { %v455_v60 = vmax.f32 %v419_v56, 0.0  ;;  %v467_v0 = vpack.c.bf16 %v457_v57, %v456_v61  ;;  %v440_v4 = vadd.f32 %v802_v58, %v720_v22 }
  0xf6   : > { %v431_v62 = vpop.f32.mrf.mxu0 }
  0xf7   : > { %v466_v63 = vpack.c.bf16 %v455_v60, %v454_v59  ;;  %v432_v2 = vadd.f32 %v720_v22, %v431_v62  ;;  %v460_v10 = vmax.f32 %v440_v4, 0.0 }
  0xf8   : > { %v803_v1 = vpop.f32.mrf.mxu0 }
  0xf9   : > { %v443_v3 = vadd.f32 %v803_v1, %v720_v22  ;;  %828 = vmatprep.mubr.bf16.mxu1 %v466_v63  ;;  %v458_v8 = vmax.f32 %v432_v2, 0.0 }
  0xfa   : > { %v434_v5 = vpop.f32.mrf.mxu0  ;;  %829 = vmatmul.mubr.bf16.gmra.mxu1 %v467_v0 }
  0xfb   : > { %v435_v6 = vadd.f32 %v720_v22, %v434_v5  ;;  %v461_v7 = vmax.f32 %v443_v3, 0.0 }
  0xfd   : > { %v459_v9 = vmax.f32 %v435_v6, 0.0  ;;  %v469_v12 = vpack.c.bf16 %v461_v7, %v460_v10 }
  0xff   : > { %v468_v11 = vpack.c.bf16 %v459_v9, %v458_v8 }
 0x101   : > { %832 = vmatprep.mubr.bf16.mxu1 %v468_v11 }
 0x102   : > { %833 = vmatmul.mubr.bf16.gmra.mxu1 %v469_v12 }
 0x1aa   : > { %v822_v14 = vpop.f32.mrf.mxu0 }
 0x1ab   : > { %v584_v15 = vadd.f32 %v822_v14, %v741_v13 }
 0x1ac   : > { %v575_v16 = vpop.f32.mrf.mxu0 }
 0x1ad   : > { %641 = vst.msk [vmem:[%s996_s8 + $0x10] sm:$0xff] %vm638_vm1, %v584_v15  ;;  %v576_v17 = vadd.f32 %v741_v13, %v575_v16 }
 0x1ae   : > { %v823_v18 = vpop.f32.mrf.mxu0 }
 0x1af   : > { %639 = vst.msk [vmem:[%s996_s8] sm:$0xff] %vm638_vm1, %v576_v17  ;;  %v587_v19 = vadd.f32 %v823_v18, %v741_v13 }
 0x1b0   : > { %v578_v20 = vpop.f32.mrf.mxu0 }
 0x1b1   : > { %642 = vst.msk [vmem:[%s996_s8 + $0x18] sm:$0xff] %vm638_vm1, %v587_v19  ;;  %v579_v21 = vadd.f32 %v741_v13, %v578_v20 }
 0x1b2   : > { %v826_v22 = vpop.f32.mrf.mxu1 }
 0x1b3   : > { %640 = vst.msk [vmem:[%s996_s8 + $0x8] sm:$0xff] %vm638_vm1, %v579_v21  ;;  %v600_v23 = vadd.f32 %v826_v22, %v741_v13 }
 0x1b4   : > { %v591_v24 = vpop.f32.mrf.mxu1 }
 0x1b5   : > { %645 = vst.msk [vmem:[%s996_s8 + $0x30] sm:$0xff] %vm638_vm1, %v600_v23  ;;  %v592_v25 = vadd.f32 %v741_v13, %v591_v24 }
 0x1b6   : > { %v827_v26 = vpop.f32.mrf.mxu1 }
 0x1b7   : > { %643 = vst.msk [vmem:[%s996_s8 + $0x20] sm:$0xff] %vm638_vm1, %v592_v25  ;;  %v603_v27 = vadd.f32 %v827_v26, %v741_v13 }
 0x1b8   : > { %v594_v28 = vpop.f32.mrf.mxu1 }
 0x1b9   : > { %646 = vst.msk [vmem:[%s996_s8 + $0x38] sm:$0xff] %vm638_vm1, %v603_v27  ;;  %v595_v29 = vadd.f32 %v741_v13, %v594_v28 }
 0x1ba   : > { %v830_v30 = vpop.f32.mrf.mxu1 }
 0x1bb   : > { %644 = vst.msk [vmem:[%s996_s8 + $0x28] sm:$0xff] %vm638_vm1, %v595_v29  ;;  %v616_v31 = vadd.f32 %v830_v30, %v741_v13 }
 0x1bc   : > { %v607_v32 = vpop.f32.mrf.mxu1 }
 0x1bd   : > { %649 = vst.msk [vmem:[%s996_s8 + $0x50] sm:$0xff] %vm638_vm1, %v616_v31  ;;  %v608_v33 = vadd.f32 %v741_v13, %v607_v32 }
 0x1be   : > { %v831_v34 = vpop.f32.mrf.mxu1 }
 0x1bf   : > { %647 = vst.msk [vmem:[%s996_s8 + $0x40] sm:$0xff] %vm638_vm1, %v608_v33  ;;  %v619_v35 = vadd.f32 %v831_v34, %v741_v13 }
 0x1c0   : > { %v610_v36 = vpop.f32.mrf.mxu1 }
 0x1c1   : > { %650 = vst.msk [vmem:[%s996_s8 + $0x58] sm:$0xff] %vm638_vm1, %v619_v35  ;;  %v611_v37 = vadd.f32 %v741_v13, %v610_v36 }
 0x1c2   : > { %v834_v38 = vpop.f32.mrf.mxu1 }
 0x1c3   : > { %648 = vst.msk [vmem:[%s996_s8 + $0x48] sm:$0xff] %vm638_vm1, %v611_v37  ;;  %v632_v39 = vadd.f32 %v834_v38, %v741_v13 }
 0x1c4   : > { %v623_v40 = vpop.f32.mrf.mxu1 }
 0x1c5   : > { %653 = vst.msk [vmem:[%s996_s8 + $0x70] sm:$0xff] %vm638_vm1, %v632_v39  ;;  %v624_v41 = vadd.f32 %v741_v13, %v623_v40 }
 0x1c6   : > { %v835_v42 = vpop.f32.mrf.mxu1 }
 0x1c7   : > { %651 = vst.msk [vmem:[%s996_s8 + $0x60] sm:$0xff] %vm638_vm1, %v624_v41  ;;  %v635_v43 = vadd.f32 %v835_v42, %v741_v13 }
 0x1c8   : > { %v626_v44 = vpop.f32.mrf.mxu1 }
 0x1c9   : > { %654 = vst.msk [vmem:[%s996_s8 + $0x78] sm:$0xff] %vm638_vm1, %v635_v43  ;;  %v627_v45 = vadd.f32 %v741_v13, %v626_v44 }
 0x1cb   : > { %652 = vst.msk [vmem:[%s996_s8 + $0x68] sm:$0xff] %vm638_vm1, %v627_v45 }
 0x1cc PF: > { %s15_s18 = sadd.s32 1, %s886_s18  }
 0x1cd   : > { %p12_p4 = scmp.ge.s32.totalorder %s15_s18, 4  }
 0x1cf   :  { %14 = sbr.rel (!%p12_p4) target bundleno = 1 (0x1), region = 70 }

</bundles_post_ra>
